<compile_context>
chip_gen: v6e
topology: v6e:2x2x1
jax: 0.10.0
libtpu: 0.0.40
codegen_flags: <defaults>
</compile_context>

<pallas_src>
import jax
import jax.numpy as jnp
from jax.experimental import pallas as pl
from jax.experimental.pallas import tpu as pltpu


# TODO(synk): RFB is not defined in the provided source and its parameters are
# never consumed by forward(); this placeholder exists only for API fidelity.
def init_fb_balance_params(in_planes=256, out_planes=256):
    key = jax.random.PRNGKey(42)
    w = jax.random.normal(key, (out_planes, in_planes, 1, 1), dtype=jnp.float32)
    return {"maskRF_placeholder_w": w}


def _copy_kernel(x_ref, o_ref):
    # Full-tile VMEM copy of the current lane-dense block.
    o_ref[...] = x_ref[...]


def _tpu_topology():
    """Best-effort (num_tensorcores, vmem_capacity_bytes); safe fallbacks."""
    num_cores = 1
    vmem_bytes = 64 * 1024 * 1024  # smallest physical VMEM across v5e/v6e/v7x
    try:
        info = pltpu.get_tpu_info()
        for attr in ("num_tensorcores", "tensorcore_count", "num_cores",
                     "core_count", "num_cores_per_chip"):
            v = getattr(info, attr, None)
            if isinstance(v, int) and v > 0:
                num_cores = v
                break
        v = getattr(info, "vmem_capacity_bytes", None)
        if isinstance(v, int) and v > 0:
            vmem_bytes = v
    except Exception:
        pass
    return num_cores, vmem_bytes


def _choose_block_rows(rows, lanes, itemsize, num_cores, block_bytes_target):
    """Pick a sublane-aligned block_rows that (a) fits the byte budget,
    (b) leaves >= num_cores blocks when the tensor is big enough, and
    (c) prefers an exact divisor of rows (no masked partial last block)."""
    subl = max(1, 32 // itemsize)  # 8 f32, 16 bf16/f16, 32 int8/fp8
    budget_rows = max(subl, block_bytes_target // (lanes * itemsize))

    min_blocks = 1
    if num_cores > 1 and rows >= num_cores * subl:
        min_blocks = num_cores  # give every TensorCore at least one block

    ub = max(subl, rows // min_blocks)
    ub = min(ub, budget_rows)

    if ub >= rows and min_blocks == 1:
        return rows  # single full-extent block: always layout-legal

    # Largest sublane-aligned divisor of rows that is <= ub.
    best = None
    d = subl
    while d <= ub:
        if rows % d == 0:
            best = d
        d += subl
    if best is not None:
        return best
    # Fall back: sublane-aligned block with a ragged (masked) last block.
    return max(subl, (ub // subl) * subl)


def _lane_dense_copy(x):
    """Copy `x` through a Pallas kernel using a lane-dense (rows, lanes) layout."""
    orig_shape = x.shape
    total = x.size
    itemsize = jnp.dtype(x.dtype).itemsize

    # Widest lane count (multiple of 128) that divides the flat size:
    # larger last dim -> unmasked, lane-dense vld/vst.
    lanes = None
    for cand in (1024, 512, 256, 128):
        if total % cand == 0:
            lanes = cand
            break
    if lanes is None:
        # TODO(synk): sizes not divisible by 128 would need a padded copy path;
        # identity semantics make a plain return equivalent.
        return x

    rows = total // lanes

    num_cores, vmem_bytes = _tpu_topology()
    # Per-block byte target: ~4 MiB on v7x (64 MiB VMEM), ~8 MiB on v5e/v6e
    # (128 MiB VMEM).  Live VMEM ~= 4x block (in + out, double-buffered).
    block_bytes_target = max(2 << 20, min(8 << 20, vmem_bytes // 16))

    block_rows = _choose_block_rows(rows, lanes, itemsize, num_cores,
                                    block_bytes_target)
    block_bytes = block_rows * lanes * itemsize

    # VMEM limit sized from actual usage, never the whole physical VMEM.
    needed = 4 * block_bytes + (4 << 20)
    vmem_limit = int(min(max(needed, 16 << 20), max(16 << 20, vmem_bytes // 2)))

    x2 = x.reshape(rows, lanes)
    grid = (pl.cdiv(rows, block_rows),)

    out = pl.pallas_call(
        _copy_kernel,
        out_shape=jax.ShapeDtypeStruct((rows, lanes), x.dtype),
        grid=grid,
        in_specs=[pl.BlockSpec((block_rows, lanes), lambda i: (i, 0))],
        out_specs=pl.BlockSpec((block_rows, lanes), lambda i: (i, 0)),
        compiler_params=pltpu.CompilerParams(
            dimension_semantics=("parallel",),
            vmem_limit_bytes=vmem_limit,
        ),
        cost_estimate=pl.CostEstimate(
            flops=0,
            transcendentals=0,
            bytes_accessed=2 * total * itemsize,
        ),
    )(x2)
    return out.reshape(orig_shape)


def fb_balance_forward(x, params=None, *, force_pallas_copy=False):
    """Identity forward pass of fbBalance.

    Default path: return x unchanged (zero-cost, lets XLA alias the buffer).
    Debug path (`force_pallas_copy=True`): materialize the identity through a
    lane-dense, large-block Pallas copy kernel.
    """
    if not force_pallas_copy:
        return x
    return _lane_dense_copy(x)


if __name__ == "__main__":
    key = jax.random.PRNGKey(0)
    # Small shapes consistent with a feature-map input: batch=2, channels=4, 16x16 spatial.
    x = jax.random.normal(key, (2, 4, 16, 16), dtype=jnp.float32)

    params = init_fb_balance_params(in_planes=4, out_planes=4)

    # Fast path: pure identity (matches the PyTorch forward exactly).
    y_fast = fb_balance_forward(x, params)

    # Debug/test path: exercise the lane-dense Pallas copy kernel once.
    y_copy = fb_balance_forward(x, params, force_pallas_copy=True)
    y_copy = jax.block_until_ready(y_copy)

    assert y_fast.shape == x.shape and y_fast.dtype == x.dtype
    assert y_copy.shape == x.shape and y_copy.dtype == x.dtype
    assert bool(jnp.all(y_fast == x))
    assert bool(jnp.all(y_copy == x))

    print("KERNEL_OK")
</pallas_src>

<mosaic_0001>
module attributes {stable_mosaic.version = 11 : i64} {
  func.func @_copy_kernel(%arg0: i32, %arg1: memref<2x1024xf32, #tpu.memory_space<vmem>>, %arg2: memref<2x1024xf32, #tpu.memory_space<vmem>>) attributes {dimension_semantics = [#tpu.dimension_semantics<parallel>], iteration_bounds = array<i64: 1>, scalar_prefetch = 0 : i64, scratch_operands = 0 : i64, tpu.core_type = #tpu.core_type<tc>, window_params = [{transform_indices = @transform_0, window_bounds = array<i64: 2, 1024>}, {transform_indices = @transform_1, window_bounds = array<i64: 2, 1024>}]} {
    %c0 = arith.constant 0 : index
    %c0_0 = arith.constant 0 : index
    %0 = vector.load %arg1[%c0, %c0_0] : memref<2x1024xf32, #tpu.memory_space<vmem>>, vector<2x1024xf32>
    %c0_1 = arith.constant 0 : index
    %c0_2 = arith.constant 0 : index
    %1 = vector.load %arg2[%c0_1, %c0_2] : memref<2x1024xf32, #tpu.memory_space<vmem>>, vector<2x1024xf32>
    tpu.vector_store %arg2[%c0_1, %c0_2], %0 {strides = array<i32>} : memref<2x1024xf32, #tpu.memory_space<vmem>>, vector<2x1024xf32>,
    return
  }
  func.func @transform_0(%arg0: i32) -> (i32, i32) {
    %c0_i32 = arith.constant 0 : i32
    %c0_i32_0 = arith.constant 0 : i32
    return %arg0, %c0_i32 : i32, i32
  }
  func.func @transform_1(%arg0: i32) -> (i32, i32) {
    %c0_i32 = arith.constant 0 : i32
    %c0_i32_0 = arith.constant 0 : i32
    return %arg0, %c0_i32 : i32, i32
  }
}

</mosaic_0001>

<bundles_post_ra>
// kernel: tpu_custom_call.1
= control target key start
LH: loop header
LB: loop body
LE: loop exit
PB: predicated region body
PF: predicated region fallthrough
CT: control target
= control target key end

     0   :  { %6 = vsyncpa [#allocation3], 0  ;;  %s104_s0 = inlined_call_operand.hbm [shape: f32[2,1024], index: 0, kind: input, shape index: {}]   ;;  %s105_s1 = inlined_call_operand.hbm [shape: f32[2,1024], index: 1, kind: output, shape index: {}]  }
   0x1   :  { %7 = vsyncpa [#allocation4], 0  ;;  %s86_s6 = smov [#allocation2]  }
   0x2   :  { %s14_s7 = sshll.u32 %s86_s6, 4  ;;  %s15_s7 = int_to_ptr.vmem [resolvable:$true] %s14_s7 }
   0x3   :  { %s50_s8 = scalar_lea.vmem %s15_s7, 256  ;;  %p55_p1 = scmp.lt.s32.totalorder %s15_s7, %s15_s7 }
   0x4   :  { %p51_p0 = scmp.ne.s32.totalorder %s15_s7, %s50_s8  ;;  %p56_p2 = scmp.lt.s32.totalorder %s50_s8, %s50_s8 }
   0x6   :  { %p57_p3 = por %p56_p2, %p55_p1 }
   0x8   :  { %p58_p4 = pnand %p57_p3, %p51_p0 }
   0xa   :  { %61 = shalt.err (!%p58_p4)
}
   0xb   :  { %17 = dma.hbm_to_vmem [thread:$0]  %s104_s0, 256, %s15_s7, [#allocation3]  }
   0xc   :  { %82 = dma.done.wait [#allocation3], 256  }
   0xd   :  { %83 = vsyncadd [#allocation3], 4294967040  ;;  %s87_s11 = smov [#allocation5]   ;;  %v21_v0 = vld [vmem:[#allocation2] sm:$0xff]  ;;  %v22_v1 = vld [vmem:[#allocation2 + $0x8] sm:$0xff] }
   0xe   :  { %s31_s12 = sshll.u32 %s87_s11, 4  ;;  %23 = vst [vmem:[#allocation5] sm:$0xff] %v21_v0  ;;  %24 = vst [vmem:[#allocation5 + $0x8] sm:$0xff] %v22_v1  ;;  %s32_s12 = int_to_ptr.vmem [resolvable:$true] %s31_s12 }
   0xf   :  { %s62_s13 = scalar_lea.vmem %s32_s12, 256  ;;  %p67_p6 = scmp.lt.s32.totalorder %s32_s12, %s32_s12 }
  0x10   :  { %p63_p5 = scmp.ne.s32.totalorder %s32_s12, %s62_s13  ;;  %p68_p7 = scmp.lt.s32.totalorder %s62_s13, %s62_s13 }
  0x12   :  { %p69_p8 = por %p68_p7, %p67_p6 }
  0x14   :  { %p70_p9 = pnand %p69_p8, %p63_p5 }
  0x16   :  { %73 = shalt.err (!%p70_p9)
}
  0x17   :  { %34 = dma.vmem_to_hbm [thread:$0]  %s32_s12, 256, %s105_s1, [#allocation4]  }
  0x18   :  { %84 = dma.done.wait [#allocation4], 256  }
  0x19   :  { %85 = vsyncadd [#allocation4], 4294967040 }
  0x1a   :  { %38 = vsyncpa [#allocation3], 1 }
  0x1b   :  { %39 = vsyncpa [#allocation4], 1 }

</bundles_post_ra>
